<compile_context>
chip_gen: v6e
topology: v6e:2x2x1
jax: 0.10.0
libtpu: 0.0.40
codegen_flags: <defaults>
</compile_context>

<pallas_src>
from functools import partial

import jax
import jax.numpy as jnp
from jax.experimental import pallas as pl
from jax.experimental.pallas import tpu as pltpu

# Static architecture constants (from the PyTorch __init__)
K1, C1_IN, C1_OUT, P1 = 8, 1, 3, 4
K2, C2_IN, C2_OUT, P2 = 6, 3, 6, 3
K3, C3_IN, C3_OUT, P3 = 4, 6, 1, 2

SUB_N = 128        # inner sub-tile: one full lane width, intermediates stay in vregs
MAX_TILE_N = 512   # per-grid-step batch tile (multiple of SUB_N); sweep 512-2048


def _round_up(a, b):
    return (a + b - 1) // b * b


def _choose_tile_n(n: int) -> int:
    """Batch tile: big enough to amortize grid-step overhead, but keep >=2 grid
    steps for mid/large batches (v7x megacore sharding)."""
    n128 = _round_up(max(n, 1), SUB_N)
    if n128 <= 2 * SUB_N:
        return SUB_N
    return min(MAX_TILE_N, _round_up((n128 + 1) // 2, SUB_N))


def _toeplitz(w, L_in, P):
    """Banded Toeplitz matrix T so that Conv1d(x, w, pad=P) == T @ x_flat.

    w: (C_out, C_in, K) PyTorch Conv1d weight.
    Returns (C_out*L_out, C_in*L_in) with L_out = L_in + 2P - K + 1.
    Row = co*L_out + t, column = ci*L_in + tau, entry = w[co,ci,tau-t+P]
    when 0 <= tau-t+P < K else 0 (zero padding absorbed).
    """
    C_out, C_in, K = w.shape
    L_out = L_in + 2 * P - K + 1
    t = jnp.arange(L_out)[:, None]
    tau = jnp.arange(L_in)[None, :]
    k_idx = tau - t + P
    valid = (k_idx >= 0) & (k_idx < K)
    k_safe = jnp.clip(k_idx, 0, K - 1)
    wt = w[:, :, k_safe] * valid[None, None, :, :].astype(w.dtype)  # (Co,Ci,Lo,Li)
    return jnp.transpose(wt, (0, 2, 1, 3)).reshape(C_out * L_out, C_in * L_in)


def prepare_params(params, L):
    """Per-weight-set preprocessing (Toeplitz matrices, expanded biases).
    Run once and reuse across forward calls — pure layout plumbing."""
    w1, b1, w2, b2, w3, b3, wlin, blin = params
    L1, L2, L3 = L + 1, L + 2, L + 3
    t1 = _toeplitz(w1, L, P1)                   # (3*L1, L)
    t2 = _toeplitz(w2, L1, P2)                  # (6*L2, 3*L1)
    t3 = _toeplitz(w3, L2, P3)                  # (L3,   6*L2)
    bb1 = jnp.repeat(b1, L1)[:, None]           # (3*L1, 1)
    bb2 = jnp.repeat(b2, L2)[:, None]           # (6*L2, 1)
    bb3 = jnp.repeat(b3, L3)[:, None]           # (L3,   1)
    wlin_col = wlin.reshape(L3, 1)              # (L3, 1)
    blin2 = blin.reshape(1, 1)                  # (1, 1)
    return (t1, bb1, t2, bb2, t3, bb3, wlin_col, blin2)


def qrs_kernel(x_ref, t1_ref, b1_ref, t2_ref, b2_ref, t3_ref, b3_ref,
               wlin_ref, blin_ref, out_ref, *, n_sub):
    """One grid step = one batch tile of TILE_N samples.

    x_ref  : (TILE_N, L)  batch on sublanes (as stored in HBM, no transpose).
    out_ref: (1, TILE_N)  batch on lanes (lane-dense store).
    Weights: whole small 2-D arrays, resident across the grid.
    """

    def process(off):
        xs = x_ref[pl.ds(off, SUB_N), :]                      # (SUB_N, L)
        # conv1: contract on x's L axis -> batch lands on lanes. (3*(L+1), SUB_N)
        h = jax.lax.dot_general(t1_ref[...], xs, (((1,), (1,)), ((), ())),
                                preferred_element_type=jnp.float32)
        h = jnp.maximum(h + b1_ref[...], 0.0)
        # conv2 -> (6*(L+2), SUB_N)
        h = jnp.dot(t2_ref[...], h, preferred_element_type=jnp.float32)
        h = jnp.maximum(h + b2_ref[...], 0.0)
        # conv3 -> (L+3, SUB_N)
        h = jnp.dot(t3_ref[...], h, preferred_element_type=jnp.float32)
        h = jnp.maximum(h + b3_ref[...], 0.0)
        # linout (L+3 -> 1): VPU multiply + sublane reduce instead of 1-row MXU matmul.
        z = jnp.sum(wlin_ref[...] * h, axis=0, keepdims=True)  # (1, SUB_N)
        out_ref[:, pl.ds(off, SUB_N)] = jax.nn.sigmoid(z + blin_ref[...])

    if n_sub <= 4:
        # Short, static trip count: fully unrolled with static (aligned) offsets.
        for j in range(n_sub):
            process(j * SUB_N)
    else:
        def body(j, carry):
            process(pl.multiple_of(j * SUB_N, SUB_N))
            return carry
        jax.lax.fori_loop(0, n_sub, body, 0)


@jax.jit
def qrs_det_1_beta_forward(x, prepared):
    """x: (N, 1, L) float32, prepared = prepare_params(params, L).
    Returns (N, 1, 1) float32."""
    t1, bb1, t2, bb2, t3, bb3, wlin_col, blin2 = prepared
    N, cin, L = x.shape
    assert cin == C1_IN

    x2d = x.reshape(N, L)                 # free squeeze — no transpose, no pad
    tile_n = _choose_tile_n(N)
    n_sub = tile_n // SUB_N
    grid = (pl.cdiv(N, tile_n),)          # partial last block handled by Pallas

    def full2d(a):  # whole small 2-D array resident in VMEM, constant per step
        return pl.BlockSpec(a.shape, lambda i: (0, 0))

    out = pl.pallas_call(
        partial(qrs_kernel, n_sub=n_sub),
        out_shape=jax.ShapeDtypeStruct((1, N), jnp.float32),
        grid=grid,
        in_specs=[
            pl.BlockSpec((tile_n, L), lambda i: (i, 0)),   # x tile (batch on sublanes)
            full2d(t1), full2d(bb1),
            full2d(t2), full2d(bb2),
            full2d(t3), full2d(bb3),
            full2d(wlin_col), full2d(blin2),
        ],
        out_specs=pl.BlockSpec((1, tile_n), lambda i: (0, i)),  # lane-dense output
        compiler_params=pltpu.CompilerParams(
            dimension_semantics=("parallel",)),
    )(x2d, t1, bb1, t2, bb2, t3, bb3, wlin_col, blin2)

    return out.reshape(N, 1, 1)


def reference_forward(x, params):
    """Pure-JAX reference matching PyTorch Conv1d/Linear semantics."""
    w1, b1, w2, b2, w3, b3, wlin, blin = params
    dn = ('NCH', 'OIH', 'NCH')

    def conv(y, w, b, p):
        y = jax.lax.conv_general_dilated(y, w, (1,), [(p, p)], dimension_numbers=dn)
        return jax.nn.relu(y + b[None, :, None])

    y = conv(x, w1, b1, P1)
    y = conv(y, w2, b2, P2)
    y = conv(y, w3, b3, P3)
    z = jnp.einsum('ncl,ol->nco', y, wlin) + blin
    return jax.nn.sigmoid(z)


if __name__ == "__main__":
    input_dim = 16   # L (module's input_dim)

    key = jax.random.PRNGKey(0)
    ks = jax.random.split(key, 9)
    f32 = jnp.float32

    # Deterministic synthetic parameters (shapes per the module's __init__).
    w1 = 0.25 * jax.random.normal(ks[1], (C1_OUT, C1_IN, K1), f32)
    b1 = 0.10 * jax.random.normal(ks[2], (C1_OUT,), f32)
    w2 = 0.25 * jax.random.normal(ks[3], (C2_OUT, C2_IN, K2), f32)
    b2 = 0.10 * jax.random.normal(ks[4], (C2_OUT,), f32)
    w3 = 0.25 * jax.random.normal(ks[5], (C3_OUT, C3_IN, K3), f32)
    b3 = 0.10 * jax.random.normal(ks[6], (C3_OUT,), f32)
    wlin = 0.25 * jax.random.normal(ks[7], (1, input_dim + 3), f32)
    blin = 0.10 * jax.random.normal(ks[8], (1,), f32)
    params = (w1, b1, w2, b2, w3, b3, wlin, blin)

    # Weight prep runs ONCE per weight set (hoisted out of the forward).
    prepared = jax.tree_util.tree_map(jax.block_until_ready,
                                      prepare_params(params, input_dim))

    # Main small test (N=2) + a multi-tile / partial-tail-block test (N=200).
    for N in (2, 200):
        xk = jax.random.fold_in(ks[0], N)
        x = jax.random.normal(xk, (N, 1, input_dim), f32)
        out = jax.block_until_ready(qrs_det_1_beta_forward(x, prepared))
        ref = reference_forward(x, params)
        assert out.shape == (N, 1, 1), out.shape
        if not jnp.allclose(out, ref, atol=1e-5, rtol=1e-4):
            raise AssertionError(
                f"Pallas kernel mismatch vs reference at N={N}:\n{out}\n{ref}")

    print("KERNEL_OK")
</pallas_src>

<mosaic_0001>
module attributes {stable_mosaic.version = 11 : i64} {
  func.func @qrs_kernel(%arg0: i32, %arg1: memref<128x16xf32, #tpu.memory_space<vmem>>, %arg2: memref<51x16xf32, #tpu.memory_space<vmem>>, %arg3: memref<51x1xf32, #tpu.memory_space<vmem>>, %arg4: memref<108x51xf32, #tpu.memory_space<vmem>>, %arg5: memref<108x1xf32, #tpu.memory_space<vmem>>, %arg6: memref<19x108xf32, #tpu.memory_space<vmem>>, %arg7: memref<19x1xf32, #tpu.memory_space<vmem>>, %arg8: memref<19x1xf32, #tpu.memory_space<vmem>>, %arg9: memref<1x1xf32, #tpu.memory_space<vmem>>, %arg10: memref<1x128xf32, #tpu.memory_space<vmem>>) attributes {dimension_semantics = [#tpu.dimension_semantics<parallel>], iteration_bounds = array<i64: 1>, scalar_prefetch = 0 : i64, scratch_operands = 0 : i64, tpu.core_type = #tpu.core_type<tc>, window_params = [{transform_indices = @transform_0, window_bounds = array<i64: 128, 16>}, {pipeline_mode = #tpu.pipeline_mode<synchronous>, transform_indices = @transform_1, window_bounds = array<i64: 51, 16>}, {pipeline_mode = #tpu.pipeline_mode<synchronous>, transform_indices = @transform_2, window_bounds = array<i64: 51, 1>}, {pipeline_mode = #tpu.pipeline_mode<synchronous>, transform_indices = @transform_3, window_bounds = array<i64: 108, 51>}, {pipeline_mode = #tpu.pipeline_mode<synchronous>, transform_indices = @transform_4, window_bounds = array<i64: 108, 1>}, {pipeline_mode = #tpu.pipeline_mode<synchronous>, transform_indices = @transform_5, window_bounds = array<i64: 19, 108>}, {pipeline_mode = #tpu.pipeline_mode<synchronous>, transform_indices = @transform_6, window_bounds = array<i64: 19, 1>}, {pipeline_mode = #tpu.pipeline_mode<synchronous>, transform_indices = @transform_7, window_bounds = array<i64: 19, 1>}, {pipeline_mode = #tpu.pipeline_mode<synchronous>, transform_indices = @transform_8, window_bounds = array<i64: 1, 1>}, {transform_indices = @transform_9, window_bounds = array<i64: 1, 128>}]} {
    %c0 = arith.constant 0 : index
    %c0_0 = arith.constant 0 : index
    %0 = vector.load %arg1[%c0, %c0_0] : memref<128x16xf32, #tpu.memory_space<vmem>>, vector<128x16xf32>
    %c0_1 = arith.constant 0 : index
    %c0_2 = arith.constant 0 : index
    %1 = vector.load %arg2[%c0_1, %c0_2] : memref<51x16xf32, #tpu.memory_space<vmem>>, vector<51x16xf32>
    %cst = arith.constant dense<0.000000e+00> : vector<51x128xf32>
    %2 = tpu.matmul %1, %0, %cst {dimension_numbers = #tpu.dot_dimension_numbers<[1], [1], [0], [0], [0, 0, 1, 0], [], []>} : vector<51x16xf32>, vector<128x16xf32>, vector<51x128xf32> -> vector<51x128xf32>
    %c0_3 = arith.constant 0 : index
    %c0_4 = arith.constant 0 : index
    %3 = vector.load %arg3[%c0_3, %c0_4] : memref<51x1xf32, #tpu.memory_space<vmem>>, vector<51x1xf32>
    %4 = vector.broadcast %3 : vector<51x1xf32> to vector<51x128xf32>
    %5 = arith.addf %2, %4 : vector<51x128xf32>
    %cst_5 = arith.constant 0.000000e+00 : f32
    %6 = vector.broadcast %cst_5 : f32 to vector<51x128xf32>
    %7 = arith.maximumf %5, %6 : vector<51x128xf32>
    %c0_6 = arith.constant 0 : index
    %c0_7 = arith.constant 0 : index
    %8 = vector.load %arg4[%c0_6, %c0_7] : memref<108x51xf32, #tpu.memory_space<vmem>>, vector<108x51xf32>
    %cst_8 = arith.constant dense<0.000000e+00> : vector<108x128xf32>
    %9 = tpu.matmul %8, %7, %cst_8 {dimension_numbers = #tpu.dot_dimension_numbers<[1], [0], [0], [1], [0, 0, 1, 1], [], []>} : vector<108x51xf32>, vector<51x128xf32>, vector<108x128xf32> -> vector<108x128xf32>
    %c0_9 = arith.constant 0 : index
    %c0_10 = arith.constant 0 : index
    %10 = vector.load %arg5[%c0_9, %c0_10] : memref<108x1xf32, #tpu.memory_space<vmem>>, vector<108x1xf32>
    %11 = vector.broadcast %10 : vector<108x1xf32> to vector<108x128xf32>
    %12 = arith.addf %9, %11 : vector<108x128xf32>
    %cst_11 = arith.constant 0.000000e+00 : f32
    %13 = vector.broadcast %cst_11 : f32 to vector<108x128xf32>
    %14 = arith.maximumf %12, %13 : vector<108x128xf32>
    %c0_12 = arith.constant 0 : index
    %c0_13 = arith.constant 0 : index
    %15 = vector.load %arg6[%c0_12, %c0_13] : memref<19x108xf32, #tpu.memory_space<vmem>>, vector<19x108xf32>
    %cst_14 = arith.constant dense<0.000000e+00> : vector<19x128xf32>
    %16 = tpu.matmul %15, %14, %cst_14 {dimension_numbers = #tpu.dot_dimension_numbers<[1], [0], [0], [1], [0, 0, 1, 1], [], []>} : vector<19x108xf32>, vector<108x128xf32>, vector<19x128xf32> -> vector<19x128xf32>
    %c0_15 = arith.constant 0 : index
    %c0_16 = arith.constant 0 : index
    %17 = vector.load %arg7[%c0_15, %c0_16] : memref<19x1xf32, #tpu.memory_space<vmem>>, vector<19x1xf32>
    %18 = vector.broadcast %17 : vector<19x1xf32> to vector<19x128xf32>
    %19 = arith.addf %16, %18 : vector<19x128xf32>
    %cst_17 = arith.constant 0.000000e+00 : f32
    %20 = vector.broadcast %cst_17 : f32 to vector<19x128xf32>
    %21 = arith.maximumf %19, %20 : vector<19x128xf32>
    %c0_18 = arith.constant 0 : index
    %c0_19 = arith.constant 0 : index
    %22 = vector.load %arg8[%c0_18, %c0_19] : memref<19x1xf32, #tpu.memory_space<vmem>>, vector<19x1xf32>
    %23 = vector.broadcast %22 : vector<19x1xf32> to vector<19x128xf32>
    %24 = arith.mulf %23, %21 : vector<19x128xf32>
    %cst_20 = arith.constant dense<0.000000e+00> : vector<128xf32>
    %25 = vector.multi_reduction <add>, %24, %cst_20 [0] : vector<19x128xf32> to vector<128xf32>
    %26 = vector.shape_cast %25 : vector<128xf32> to vector<1x128xf32>
    %c0_21 = arith.constant 0 : index
    %c0_22 = arith.constant 0 : index
    %27 = vector.load %arg9[%c0_21, %c0_22] : memref<1x1xf32, #tpu.memory_space<vmem>>, vector<1x1xf32>
    %28 = vector.broadcast %27 : vector<1x1xf32> to vector<1x128xf32>
    %29 = arith.addf %26, %28 : vector<1x128xf32>
    %30 = arith.negf %29 : vector<1x128xf32>
    %31 = math.exp %30 : vector<1x128xf32>
    %cst_23 = arith.constant 1.000000e+00 : f32
    %32 = vector.broadcast %cst_23 : f32 to vector<1x128xf32>
    %33 = arith.addf %32, %31 : vector<1x128xf32>
    %34 = arith.divf %32, %33 : vector<1x128xf32>
    %c0_24 = arith.constant 0 : index
    %c0_25 = arith.constant 0 : index
    %35 = vector.load %arg10[%c0_24, %c0_25] : memref<1x128xf32, #tpu.memory_space<vmem>>, vector<1x128xf32>
    tpu.vector_store %arg10[%c0_24, %c0_25], %34 {strides = array<i32>} : memref<1x128xf32, #tpu.memory_space<vmem>>, vector<1x128xf32>,
    return
  }
  func.func @transform_0(%arg0: i32) -> (i32, i32) {
    %c0_i32 = arith.constant 0 : i32
    %c0_i32_0 = arith.constant 0 : i32
    return %arg0, %c0_i32 : i32, i32
  }
  func.func @transform_1(%arg0: i32) -> (i32, i32) {
    %c0_i32 = arith.constant 0 : i32
    %c0_i32_0 = arith.constant 0 : i32
    %c0_i32_1 = arith.constant 0 : i32
    return %c0_i32, %c0_i32_0 : i32, i32
  }
  func.func @transform_2(%arg0: i32) -> (i32, i32) {
    %c0_i32 = arith.constant 0 : i32
    %c0_i32_0 = arith.constant 0 : i32
    %c0_i32_1 = arith.constant 0 : i32
    return %c0_i32, %c0_i32_0 : i32, i32
  }
  func.func @transform_3(%arg0: i32) -> (i32, i32) {
    %c0_i32 = arith.constant 0 : i32
    %c0_i32_0 = arith.constant 0 : i32
    %c0_i32_1 = arith.constant 0 : i32
    return %c0_i32, %c0_i32_0 : i32, i32
  }
  func.func @transform_4(%arg0: i32) -> (i32, i32) {
    %c0_i32 = arith.constant 0 : i32
    %c0_i32_0 = arith.constant 0 : i32
    %c0_i32_1 = arith.constant 0 : i32
    return %c0_i32, %c0_i32_0 : i32, i32
  }
  func.func @transform_5(%arg0: i32) -> (i32, i32) {
    %c0_i32 = arith.constant 0 : i32
    %c0_i32_0 = arith.constant 0 : i32
    %c0_i32_1 = arith.constant 0 : i32
    return %c0_i32, %c0_i32_0 : i32, i32
  }
  func.func @transform_6(%arg0: i32) -> (i32, i32) {
    %c0_i32 = arith.constant 0 : i32
    %c0_i32_0 = arith.constant 0 : i32
    %c0_i32_1 = arith.constant 0 : i32
    return %c0_i32, %c0_i32_0 : i32, i32
  }
  func.func @transform_7(%arg0: i32) -> (i32, i32) {
    %c0_i32 = arith.constant 0 : i32
    %c0_i32_0 = arith.constant 0 : i32
    %c0_i32_1 = arith.constant 0 : i32
    return %c0_i32, %c0_i32_0 : i32, i32
  }
  func.func @transform_8(%arg0: i32) -> (i32, i32) {
    %c0_i32 = arith.constant 0 : i32
    %c0_i32_0 = arith.constant 0 : i32
    %c0_i32_1 = arith.constant 0 : i32
    return %c0_i32, %c0_i32_0 : i32, i32
  }
  func.func @transform_9(%arg0: i32) -> (i32, i32) {
    %c0_i32 = arith.constant 0 : i32
    %c0_i32_0 = arith.constant 0 : i32
    return %c0_i32, %arg0 : i32, i32
  }
}

</mosaic_0001>

<bundles_post_ra>
// kernel: qrs_det_1_beta_forward.1
= control target key start
LH: loop header
LB: loop body
LE: loop exit
PB: predicated region body
PF: predicated region fallthrough
CT: control target
= control target key end

     0   :  { %s1369_s0 = inlined_call_operand.vmem [shape: f32[2,16], index: 0, kind: input, shape index: {}]   ;;  %s1370_s1 = inlined_call_operand.vmem [shape: f32[51,16], index: 1, kind: input, shape index: {}]   ;;  %s1371_s2 = inlined_call_operand.vmem [shape: f32[51,1], index: 2, kind: input, shape index: {}]   ;;  %s1372_s3 = inlined_call_operand.vmem [shape: f32[108,51], index: 3, kind: input, shape index: {}]   ;;  %s1373_s4 = inlined_call_operand.vmem [shape: f32[108,1], index: 4, kind: input, shape index: {}]   ;;  %s1374_s5 = inlined_call_operand.vmem [shape: f32[19,108], index: 5, kind: input, shape index: {}]   ;;  %s1375_s6 = inlined_call_operand.vmem [shape: f32[19,1], index: 6, kind: input, shape index: {}]   ;;  %s1376_s7 = inlined_call_operand.vmem [shape: f32[19,1], index: 7, kind: input, shape index: {}]   ;;  %s1377_s8 = inlined_call_operand.<no memory space> [shape: f32[1,1], index: 8, kind: input, shape index: {}]   ;;  %s1378_s9 = inlined_call_operand.hbm [shape: f32[1,2], index: 9, kind: output, shape index: {}]  }
   0x1   :  { %v14_v0 = vstv %s1377_s8 }
   0x2   :  { %15 = vst [vmem:[#allocation2] sm:$0x1] %v14_v0 }
   0x3   :  { %v50_v1 = vld [vmem:[%s1369_s0 + $0x78] sm:$0xff]  ;;  %vm100_vm0 = vcmask 130048   ;;  %v1012_v2 = vmov 0.0   ;;  %vm1013_vm1 = vmmov 0   ;;  %v1014_v3 = vmov 0   ;;  %v49_v4 = vld [vmem:[%s1369_s0 + $0x70] sm:$0xff] }
   0x4   :  { %855 = vmatprep.subr.mxu0 %v1012_v2  ;;  %887 = vmatprep.mubr.msk.f32.mxu0 %vm1013_vm1, %v1012_v2  ;;  %v48_v5 = vld [vmem:[%s1369_s0 + $0x68] sm:$0xff]  ;;  %v64_v6 = vld [vmem:[%s1371_s2 + $0x30] sm:$0x7]  ;;  %v62_v7 = vld [vmem:[%s1371_s2 + $0x20] sm:$0xff] }
   0x5   :  { %856 = vmatpush3.xpose.msk.msra.mxu0 %vm100_vm0, %v50_v1  ;;  %984 = vset.pattern.permute.xlu0 %v1014_v3  ;;  %v63_v8 = vld [vmem:[%s1371_s2 + $0x28] sm:$0xff]  ;;  %v61_v9 = vld [vmem:[%s1371_s2 + $0x18] sm:$0xff]  ;;  %v47_v10 = vld [vmem:[%s1369_s0 + $0x60] sm:$0xff] }
   0x6   :  { %857 = vmatprep.subr.mxu0 %v1012_v2  ;;  %985 = vset.pattern.permute.xlu1 %v1014_v3  ;;  %v60_v11 = vld [vmem:[%s1371_s2 + $0x10] sm:$0xff]  ;;  %v59_v12 = vld [vmem:[%s1371_s2 + $0x8] sm:$0xff]  ;;  %v46_v13 = vld [vmem:[%s1369_s0 + $0x58] sm:$0xff] }
   0x7   :  { %97 = vperm.xlu0 %984, %v64_v6   ;;  %87 = vperm.xlu1 %985, %v62_v7   ;;  %v58_v14 = vld [vmem:[%s1371_s2] sm:$0xff] }
   0x9   :  { %858 = vmatpush3.xpose.msk.msra.mxu0 %vm100_vm0, %v49_v4 }
   0xa   :  { %859 = vmatprep.subr.mxu0 %v1012_v2 }
   0xb   :  { %92 = vperm.xlu0 %984, %v63_v8   ;;  %82 = vperm.xlu1 %985, %v61_v9  }
   0xd   :  { %860 = vmatpush3.xpose.msk.msra.mxu0 %vm100_vm0, %v48_v5 }
   0xe   :  { %861 = vmatprep.subr.mxu0 %v1012_v2 }
   0xf   :  { %77 = vperm.xlu0 %984, %v60_v11   ;;  %72 = vperm.xlu1 %985, %v59_v12  }
  0x11   :  { %862 = vmatpush3.xpose.msk.msra.mxu0 %vm100_vm0, %v47_v10 }
  0x12   :  { %863 = vmatprep.subr.mxu0 %v1012_v2 }
  0x13   :  { %16 = vsyncpa [#allocation4], 0  ;;  %v304_v15 = vld [vmem:[%s1373_s4 + $0x68] sm:$0xf]  ;;  %v45_v16 = vld [vmem:[%s1369_s0 + $0x50] sm:$0xff]  ;;  %67 = vperm.xlu0 %984, %v58_v14   ;;  %vm375_vm2 = vcmask 416768  }
  0x14   :  { %372 = vperm.xlu1 %985, %v304_v15   ;;  %v303_v17 = vld [vmem:[%s1373_s4 + $0x60] sm:$0xff]  ;;  %v302_v18 = vld [vmem:[%s1373_s4 + $0x58] sm:$0xff]  ;;  %v44_v19 = vld [vmem:[%s1369_s0 + $0x48] sm:$0xff]  ;;  %vm418_vm3 = vcmask 1042432   ;;  %vm602_vm4 = vcmask 1043456   ;;  %vm592_vm5 = vcmask 883712  }
  0x15   :  { %864 = vmatpush3.xpose.msk.msra.mxu0 %vm100_vm0, %v46_v13  ;;  %v301_v20 = vld [vmem:[%s1373_s4 + $0x50] sm:$0xff]  ;;  %v300_v21 = vld [vmem:[%s1373_s4 + $0x48] sm:$0xff]  ;;  %v43_v22 = vld [vmem:[%s1369_s0 + $0x40] sm:$0xff] }
  0x16   :  { %865 = vmatprep.subr.mxu0 %v1012_v2  ;;  %v299_v23 = vld [vmem:[%s1373_s4 + $0x40] sm:$0xff]  ;;  %v298_v24 = vld [vmem:[%s1373_s4 + $0x38] sm:$0xff]  ;;  %v297_v26 = vld [vmem:[%s1373_s4 + $0x30] sm:$0xff] }
  0x17   :  { %367 = vperm.xlu0 %984, %v303_v17   ;;  %v42_v25 = vld [vmem:[%s1369_s0 + $0x38] sm:$0xff]  ;;  %v296_v27 = vld [vmem:[%s1373_s4 + $0x28] sm:$0xff]  ;;  %v41_v28 = vld [vmem:[%s1369_s0 + $0x30] sm:$0xff] }
  0x18   :  { %362 = vperm.xlu1 %985, %v302_v18   ;;  %v295_v29 = vld [vmem:[%s1373_s4 + $0x20] sm:$0xff]  ;;  %v294_v30 = vld [vmem:[%s1373_s4 + $0x18] sm:$0xff]  ;;  %v40_v31 = vld [vmem:[%s1369_s0 + $0x28] sm:$0xff] }
  0x19   :  { %866 = vmatpush3.xpose.msk.msra.mxu0 %vm100_vm0, %v45_v16  ;;  %v293_v32 = vld [vmem:[%s1373_s4 + $0x10] sm:$0xff]  ;;  %v292_v33 = vld [vmem:[%s1373_s4 + $0x8] sm:$0xff]  ;;  %v39_v34 = vld [vmem:[%s1369_s0 + $0x20] sm:$0xff] }
  0x1a   :  { %867 = vmatprep.subr.mxu0 %v1012_v2  ;;  %v291_v35 = vld [vmem:[%s1373_s4] sm:$0xff]  ;;  %v38_v37 = vld [vmem:[%s1369_s0 + $0x18] sm:$0xff]  ;;  %v575_v38 = vld [vmem:[%s1375_s6 + $0x8] sm:$0xff] }
  0x1b   :  { %357 = vperm.xlu0 %984, %v301_v20   ;;  %v574_v36 = vld [vmem:[%s1375_s6] sm:$0xff]  ;;  %v576_v39 = vld [vmem:[%s1375_s6 + $0x10] sm:$0x7]  ;;  %v690_v42 = vld [vmem:[%s1376_s7 + $0x8] sm:$0xff] }
  0x1c   :  { %352 = vperm.xlu1 %985, %v300_v21   ;;  %v37_v40 = vld [vmem:[%s1369_s0 + $0x10] sm:$0xff]  ;;  %v689_v41 = vld [vmem:[%s1376_s7] sm:$0xff]  ;;  %v36_v43 = vld [vmem:[%s1369_s0 + $0x8] sm:$0xff] }
  0x1d   :  { %868 = vmatpush3.xpose.msk.msra.mxu0 %vm100_vm0, %v44_v19  ;;  %v691_v44 = vld [vmem:[%s1376_s7 + $0x10] sm:$0x7]  ;;  %v719_v45 = vld [vmem:[#allocation2] sm:$0x1]  ;;  %v52_v48 = vld [vmem:[%s1370_s1 + $0x8] sm:$0xff] }
  0x1e   :  { %869 = vmatprep.subr.mxu0 %v1012_v2  ;;  %v35_v46 = vld [vmem:[%s1369_s0] sm:$0xff]  ;;  %v53_v49 = vld [vmem:[%s1370_s1 + $0x10] sm:$0xff]  ;;  %v54_v50 = vld [vmem:[%s1370_s1 + $0x18] sm:$0xff] }
  0x1f   :  { %347 = vperm.xlu0 %984, %v299_v23   ;;  %v51_v47 = vld [vmem:[%s1370_s1] sm:$0xff]  ;;  %v56_v52 = vld [vmem:[%s1370_s1 + $0x28] sm:$0xff]  ;;  %v57_v53 = vld [vmem:[%s1370_s1 + $0x30] sm:$0x7] }
  0x20   :  { %342 = vperm.xlu1 %985, %v298_v24   ;;  %v55_v51 = vld [vmem:[%s1370_s1 + $0x20] sm:$0xff] }
  0x21   :  { %870 = vmatpush3.xpose.msk.msra.mxu0 %vm100_vm0, %v43_v22  ;;  %v277_v54 = vld [vmem:[%s1372_s3] sm:$0xff] }
  0x22   :  { %871 = vmatprep.subr.mxu0 %v1012_v2  ;;  %922 = vmatprep.mubr.msk.f32.mxu1 %vm375_vm2, %v277_v54 }
  0x23   :  { %337 = vperm.xlu0 %984, %v297_v26  }
  0x24   :  { %332 = vperm.xlu1 %985, %v296_v27   ;;  %v278_v27 = vld [vmem:[%s1372_s3 + $0x8] sm:$0xff] }
  0x25   :  { %872 = vmatpush3.xpose.msk.msra.mxu0 %vm100_vm0, %v42_v25 }
  0x26   :  { %873 = vmatprep.subr.mxu0 %v1012_v2 }
  0x27   :  { %327 = vperm.xlu0 %984, %v295_v29   ;;  %v280_v29 = vld [vmem:[%s1372_s3 + $0x18] sm:$0xff] }
  0x28   :  { %322 = vperm.xlu1 %985, %v294_v30   ;;  %v281_v30 = vld [vmem:[%s1372_s3 + $0x20] sm:$0xff] }
  0x29   :  { %874 = vmatpush3.xpose.msk.msra.mxu0 %vm100_vm0, %v41_v28  ;;  %v279_v28 = vld [vmem:[%s1372_s3 + $0x10] sm:$0xff] }
  0x2a   :  { %875 = vmatprep.subr.mxu0 %v1012_v2 }
  0x2b   :  { %317 = vperm.xlu0 %984, %v293_v32   ;;  %v283_v32 = vld [vmem:[%s1372_s3 + $0x30] sm:$0xff] }
  0x2c   :  { %312 = vperm.xlu1 %985, %v292_v33   ;;  %v284_v33 = vld [vmem:[%s1372_s3 + $0x38] sm:$0xff] }
  0x2d   :  { %876 = vmatpush3.xpose.msk.msra.mxu0 %vm100_vm0, %v40_v31  ;;  %v282_v31 = vld [vmem:[%s1372_s3 + $0x28] sm:$0xff] }
  0x2e   :  { %877 = vmatprep.subr.mxu0 %v1012_v2 }
  0x2f   :  { %307 = vperm.xlu0 %984, %v291_v35   ;;  %v286_v35 = vld [vmem:[%s1372_s3 + $0x48] sm:$0xff] }
  0x30   :  { %579 = vperm.xlu1 %985, %v574_v36   ;;  %v287_v36 = vld [vmem:[%s1372_s3 + $0x50] sm:$0xff] }
  0x31   :  { %878 = vmatpush3.xpose.msk.msra.mxu0 %vm100_vm0, %v39_v34  ;;  %v285_v34 = vld [vmem:[%s1372_s3 + $0x40] sm:$0xff] }
  0x32   :  { %879 = vmatprep.subr.mxu0 %v1012_v2 }
  0x33   :  { %584 = vperm.xlu0 %984, %v575_v38   ;;  %v289_v38 = vld [vmem:[%s1372_s3 + $0x60] sm:$0xff] }
  0x34   :  { %589 = vperm.xlu1 %985, %v576_v39   ;;  %v290_v39 = vld [vmem:[%s1372_s3 + $0x68] sm:$0xf] }
  0x35   :  { %880 = vmatpush3.xpose.msk.msra.mxu0 %vm100_vm0, %v38_v37  ;;  %v288_v37 = vld [vmem:[%s1372_s3 + $0x58] sm:$0xff] }
  0x36   :  { %881 = vmatprep.subr.mxu0 %v1012_v2 }
  0x37   :  { %694 = vperm.xlu0 %984, %v689_v41  }
  0x38   :  { %699 = vperm.xlu1 %985, %v690_v42  }
  0x39   :  { %882 = vmatpush3.xpose.msk.msra.mxu0 %vm100_vm0, %v37_v40 }
  0x3a   :  { %883 = vmatprep.subr.mxu0 %v1012_v2 }
  0x3b   :  { %704 = vperm.xlu0 %984, %v691_v44  }
  0x3c   :  { %722 = vperm.xlu1 %985, %v719_v45  }
  0x3d   :  { %884 = vmatpush3.xpose.msk.msra.mxu0 %vm100_vm0, %v36_v43 }
  0x3e   :  { %885 = vmatprep.subr.mxu0 %v1012_v2 }
  0x41   :  { %886 = vmatpush3.xpose.msk.msra.mxu0 %vm100_vm0, %v35_v46 }
  0x44   :  { %888 = vmatmul.mubr.msk.f32.vlgmr.msra.gmra.mxu0 %vm100_vm0, %v51_v47 }
  0x45   :  { %890 = vmatprep.mubr.msk.f32.mxu0 %vm1013_vm1, %v1012_v2 }
  0x48   :  { %891 = vmatmul.mubr.msk.f32.gmra.mxu0 %vm100_vm0, %v52_v48 }
  0x49   :  { %893 = vmatprep.mubr.msk.f32.mxu0 %vm1013_vm1, %v1012_v2 }
  0x4c   :  { %894 = vmatmul.mubr.msk.f32.gmra.mxu0 %vm100_vm0, %v53_v49 }
  0x4d   :  { %896 = vmatprep.mubr.msk.f32.mxu0 %vm1013_vm1, %v1012_v2 }
  0x50   :  { %897 = vmatmul.mubr.msk.f32.gmra.mxu0 %vm100_vm0, %v54_v50 }
  0x51   :  { %899 = vmatprep.mubr.msk.f32.mxu0 %vm1013_vm1, %v1012_v2 }
  0x54   :  { %900 = vmatmul.mubr.msk.f32.gmra.mxu0 %vm100_vm0, %v55_v51 }
  0x55   :  { %902 = vmatprep.mubr.msk.f32.mxu0 %vm1013_vm1, %v1012_v2 }
  0x58   :  { %903 = vmatmul.mubr.msk.f32.gmra.mxu0 %vm100_vm0, %v56_v52 }
  0x59   :  { %905 = vmatprep.mubr.msk.f32.mxu0 %vm1013_vm1, %v1012_v2 }
  0x5c   :  { %906 = vmatmul.mubr.msk.f32.gmra.mxu0 %vm100_vm0, %v57_v53 }
  0x82   :  { %v98_v63 = vpop.permute.xlu0 %97  ;;  %v88_v3 = vpop.permute.xlu1 %87 }
  0x86   :  { %v93_v5 = vpop.permute.xlu0 %92  ;;  %v83_v10 = vpop.permute.xlu1 %82 }
  0x8a   :  { %v78_v14 = vpop.permute.xlu0 %77  ;;  %v73_v19 = vpop.permute.xlu1 %72 }
  0x8e   :  { %v68_v22 = vpop.permute.xlu0 %67 }
  0x8f   :  { %v373_v45 = vpop.permute.xlu1 %372 }
  0x92   :  { %v368_v47 = vpop.permute.xlu0 %367 }
  0x93   :  { %v363_v50 = vpop.permute.xlu1 %362 }
  0x96   :  { %v358_v52 = vpop.permute.xlu0 %357 }
 0x104   :  { %v236_v55 = vpop.f32.mrf.mxu0 }
 0x105   :  { %v237_v23 = vadd.f32 %v236_v55, %v68_v22  ;;  %v353_v55 = vpop.permute.xlu1 %352 }
 0x106   :  { %v889_v56 = vpop.f32.mrf.mxu0 }
 0x107   :  { %v270_v26 = vmax.f32 %v237_v23, 0.0 }
 0x108   :  { %v241_v57 = vpop.f32.mrf.mxu0 }
 0x109   :  { %v242_v20 = vadd.f32 %v241_v57, %v73_v19  ;;  %v348_v57 = vpop.permute.xlu0 %347 }
 0x10a   :  { %v892_v58 = vpop.f32.mrf.mxu0 }
 0x10b   :  { %v271_v25 = vmax.f32 %v242_v20, 0.0 }
 0x10c   :  { %v246_v59 = vpop.f32.mrf.mxu0 }
 0x10d   :  { %v247_v17 = vadd.f32 %v246_v59, %v78_v14 }
 0x10e   :  { %v895_v60 = vpop.f32.mrf.mxu0 }
 0x10f   :  { %v272_v24 = vmax.f32 %v247_v17, 0.0 }
 0x110   :  { %v251_v61 = vpop.f32.mrf.mxu0 }
 0x111   :  { %v252_v15 = vadd.f32 %v251_v61, %v83_v10 }
 0x112   :  { %v898_v62 = vpop.f32.mrf.mxu0 }
 0x113   :  { %v273_v21 = vmax.f32 %v252_v15, 0.0 }
 0x114   :  { %v256_v0 = vpop.f32.mrf.mxu0 }
 0x115   :  { %v257_v12 = vadd.f32 %v256_v0, %v88_v3  ;;  %v343_v0 = vpop.permute.xlu1 %342 }
 0x116   :  { %v901_v1 = vpop.f32.mrf.mxu0 }
 0x117   :  { %v274_v18 = vmax.f32 %v257_v12, 0.0 }
 0x118   :  { %v261_v4 = vpop.f32.mrf.mxu0 }
 0x119   :  { %v262_v8 = vadd.f32 %v261_v4, %v93_v5  ;;  %v338_v4 = vpop.permute.xlu0 %337 }
 0x11a   :  { %v904_v6 = vpop.f32.mrf.mxu0 }
 0x11b   :  { %v275_v16 = vmax.f32 %v262_v8, 0.0 }
 0x11c   :  { %v266_v7 = vpop.f32.mrf.mxu0 }
 0x11d   :  { %v267_v9 = vadd.f32 %v266_v7, %v98_v63  ;;  %v328_v12 = vpop.permute.xlu0 %327 }
 0x11e   :  { %v907_v11 = vpop.f32.mrf.mxu0 }
 0x11f   :  { %v276_v13 = vmax.f32 %v267_v9, 0.0  ;;  %v333_v9 = vpop.permute.xlu1 %332 }
 0x121   :  { %908 = vmatprep.subr.msk.mxu1 %vm418_vm3, %v276_v13  ;;  %v318_v20 = vpop.permute.xlu0 %317 }
 0x122   :  { %909 = vmatpush3.msk.msra.mxu1 %vm418_vm3, %v276_v13 }
 0x123   :  { %910 = vmatprep.subr.mxu1 %v275_v16  ;;  %v323_v17 = vpop.permute.xlu1 %322 }
 0x124   :  { %911 = vmatpush3.msra.mxu1 %v275_v16 }
 0x125   :  { %912 = vmatprep.subr.mxu1 %v274_v18 }
 0x126   :  { %913 = vmatpush3.msra.mxu1 %v274_v18 }
 0x127   :  { %914 = vmatprep.subr.mxu1 %v273_v21 }
 0x128   :  { %915 = vmatpush3.msra.mxu1 %v273_v21 }
 0x129   :  { %916 = vmatprep.subr.mxu1 %v272_v24 }
 0x12a   :  { %917 = vmatpush3.msra.mxu1 %v272_v24 }
 0x12b   :  { %918 = vmatprep.subr.mxu1 %v271_v25 }
 0x12c   :  { %919 = vmatpush3.msra.mxu1 %v271_v25  ;;  %v313_v25 = vpop.permute.xlu1 %312 }
 0x12d   :  { %920 = vmatprep.subr.mxu1 %v270_v26 }
 0x12e   :  { %921 = vmatpush3.msra.mxu1 %v270_v26 }
 0x12f   :  { %923 = vmatmul.mubr.msk.f32.vlgmr.msra.gmra.mxu1 %vm375_vm2, %v278_v27  ;;  %943 = vmatprep.subr.mxu1 %v1012_v2 }
 0x130   :  { %925 = vmatprep.mubr.msk.f32.mxu1 %vm375_vm2, %v279_v28  ;;  %v308_v28 = vpop.permute.xlu0 %307 }
 0x133   :  { %926 = vmatmul.mubr.msk.f32.gmra.mxu1 %vm375_vm2, %v280_v29 }
 0x134   :  { %928 = vmatprep.mubr.msk.f32.mxu1 %vm375_vm2, %v281_v30 }
 0x137   :  { %929 = vmatmul.mubr.msk.f32.gmra.mxu1 %vm375_vm2, %v282_v31 }
 0x138   :  { %931 = vmatprep.mubr.msk.f32.mxu1 %vm375_vm2, %v283_v32 }
 0x13b   :  { %932 = vmatmul.mubr.msk.f32.gmra.mxu1 %vm375_vm2, %v284_v33  ;;  %v571_v33 = vld [vmem:[%s1374_s5] sm:$0xff] }
 0x13c   :  { %934 = vmatprep.mubr.msk.f32.mxu1 %vm375_vm2, %v285_v34  ;;  %v572_v34 = vld [vmem:[%s1374_s5 + $0x8] sm:$0xff] }
 0x13f   :  { %935 = vmatmul.mubr.msk.f32.gmra.mxu1 %vm375_vm2, %v286_v35  ;;  %v573_v35 = vld [vmem:[%s1374_s5 + $0x10] sm:$0x7]  ;;  %s1015_s5 = smov [#allocation3]  }
 0x140   :  { %937 = vmatprep.mubr.msk.f32.mxu1 %vm375_vm2, %v287_v36  ;;  %v580_v36 = vpop.permute.xlu1 %579  ;;  %s743_s2 = sshll.u32 %s1015_s5, 4  ;;  %s744_s2 = int_to_ptr.vmem [resolvable:$true] %s743_s2 }
 0x141   :  { %s990_s18 = scalar_lea.vmem %s744_s2, 16  ;;  %s994_s19 = scalar_lea.vmem %s744_s2, 32 }
 0x142   :  { %p991_p0 = scmp.ne.s32.totalorder %s744_s2, %s990_s18  ;;  %p995_p1 = scmp.lt.s32.totalorder %s744_s2, %s744_s2 }
 0x143   :  { %938 = vmatmul.mubr.msk.f32.gmra.mxu1 %vm375_vm2, %v288_v37  ;;  %v585_v37 = vpop.permute.xlu0 %584  ;;  %p996_p2 = scmp.lt.s32.totalorder %s994_s19, %s990_s18 }
 0x144   :  { %940 = vmatprep.mubr.msk.f32.mxu1 %vm375_vm2, %v289_v38 }
 0x145   :  { %p997_p3 = por %p996_p2, %p995_p1 }
 0x147   :  { %941 = vmatmul.mubr.msk.f32.gmra.mxu1 %vm375_vm2, %v290_v39  ;;  %p998_p4 = pnand %p997_p3, %p991_p0 }
 0x148   :  { %971 = vmatprep.mubr.msk.f32.mxu1 %vm1013_vm1, %v1012_v2 }
 0x1ef   :  { %v1333_v40 = vpop.f32.mrf.mxu1 }
 0x1f0   :  { %v494_v26 = vadd.f32 %v1333_v40, %v313_v25  ;;  %v590_v40 = vpop.permute.xlu1 %589 }
 0x1f1   :  { %v1335_v41 = vpop.f32.mrf.mxu1 }
 0x1f2   :  { %v489_v29 = vadd.f32 %v1335_v41, %v308_v28  ;;  %v558_v31 = vmax.f32 %v494_v26, 0.0 }
 0x1f3   :  { %v927_v42 = vpop.f32.mrf.mxu1 }
 0x1f4   :  { %v504_v21 = vadd.f32 %v927_v42, %v323_v17  ;;  %v557_v32 = vmax.f32 %v489_v29, 0.0 }
 0x1f5   :  { %v498_v43 = vpop.f32.mrf.mxu1 }
 0x1f6   :  { %v499_v23 = vadd.f32 %v498_v43, %v318_v20  ;;  %v560_v27 = vmax.f32 %v504_v21, 0.0 }
 0x1f7   :  { %v930_v44 = vpop.f32.mrf.mxu1 }
 0x1f8   :  { %v514_v15 = vadd.f32 %v930_v44, %v333_v9  ;;  %v559_v30 = vmax.f32 %v499_v23, 0.0  ;;  %v695_v44 = vpop.permute.xlu0 %694 }
 0x1f9   :  { %v508_v46 = vpop.f32.mrf.mxu1 }
 0x1fa   :  { %v509_v18 = vadd.f32 %v508_v46, %v328_v12  ;;  %v562_v22 = vmax.f32 %v514_v15, 0.0 }
 0x1fb   :  { %v933_v48 = vpop.f32.mrf.mxu1 }
 0x1fc   :  { %v524_v10 = vadd.f32 %v933_v48, %v343_v0  ;;  %v561_v24 = vmax.f32 %v509_v18, 0.0 }
 0x1fd   :  { %v518_v49 = vpop.f32.mrf.mxu1 }
 0x1fe   :  { %v519_v13 = vadd.f32 %v518_v49, %v338_v4  ;;  %v564_v16 = vmax.f32 %v524_v10, 0.0  ;;  %v700_v49 = vpop.permute.xlu1 %699 }
 0x1ff   :  { %v936_v51 = vpop.f32.mrf.mxu1 }
 0x200   :  { %v534_v5 = vadd.f32 %v936_v51, %v353_v55  ;;  %v563_v19 = vmax.f32 %v519_v13, 0.0 }
 0x201   :  { %v528_v53 = vpop.f32.mrf.mxu1 }
 0x202   :  { %v529_v7 = vadd.f32 %v528_v53, %v348_v57  ;;  %v566_v11 = vmax.f32 %v534_v5, 0.0  ;;  %v705_v53 = vpop.permute.xlu0 %704 }
 0x203   :  { %v939_v54 = vpop.f32.mrf.mxu1 }
 0x204   :  { %v544_v61 = vadd.f32 %v939_v54, %v363_v50  ;;  %v565_v14 = vmax.f32 %v529_v7, 0.0 }
 0x205   :  { %v538_v56 = vpop.f32.mrf.mxu1 }
 0x206   :  { %v539_v1 = vadd.f32 %v538_v56, %v358_v52  ;;  %v568_v6 = vmax.f32 %v544_v61, 0.0 }
 0x207   :  { %v942_v58 = vpop.f32.mrf.mxu1 }
 0x208   :  { %v554_v59 = vadd.f32 %v942_v58, %v373_v45  ;;  %v567_v8 = vmax.f32 %v539_v1, 0.0  ;;  %v725_v58 = vlaneseq }
 0x209   :  { %v548_v60 = vpop.f32.mrf.mxu1 }
 0x20a   :  { %v570_v62 = vmax.f32 %v554_v59, 0.0  ;;  %v549_v63 = vadd.f32 %v548_v60, %v368_v47  ;;  %v726_v61 = vshrl.u32 %v725_v58, 7 }
 0x20c   :  { %v569_v3 = vmax.f32 %v549_v63, 0.0  ;;  %944 = vmatpush3.msk.msra.mxu1 %vm602_vm4, %v570_v62  ;;  %v727_v0 = vsub.s32 0, %v726_v61 }
 0x20d   :  { %945 = vmatprep.subr.mxu1 %v1012_v2 }
 0x20e   :  { %946 = vmatpush3.msra.mxu1 %v569_v3  ;;  %v723_v3 = vpop.permute.xlu1 %722 }
 0x20f   :  { %947 = vmatprep.subr.mxu1 %v1012_v2  ;;  %v728_v5 = vrot.slane %v723_v3, %v727_v0 }
 0x210   :  { %948 = vmatpush3.msra.mxu1 %v568_v6 }
 0x211   :  { %949 = vmatprep.subr.mxu1 %v1012_v2 }
 0x212   :  { %950 = vmatpush3.msra.mxu1 %v567_v8 }
 0x213   :  { %951 = vmatprep.subr.mxu1 %v1012_v2 }
 0x214   :  { %952 = vmatpush3.msra.mxu1 %v566_v11 }
 0x215   :  { %953 = vmatprep.subr.mxu1 %v1012_v2 }
 0x216   :  { %954 = vmatpush3.msra.mxu1 %v565_v14 }
 0x217   :  { %955 = vmatprep.subr.mxu1 %v1012_v2 }
 0x218   :  { %956 = vmatpush3.msra.mxu1 %v564_v16 }
 0x219   :  { %957 = vmatprep.subr.mxu1 %v1012_v2 }
 0x21a   :  { %958 = vmatpush3.msra.mxu1 %v563_v19 }
 0x21b   :  { %959 = vmatprep.subr.mxu1 %v1012_v2 }
 0x21c   :  { %960 = vmatpush3.msra.mxu1 %v562_v22 }
 0x21d   :  { %961 = vmatprep.subr.mxu1 %v1012_v2 }
 0x21e   :  { %962 = vmatpush3.msra.mxu1 %v561_v24 }
 0x21f   :  { %963 = vmatprep.subr.mxu1 %v1012_v2 }
 0x220   :  { %964 = vmatpush3.msra.mxu1 %v560_v27 }
 0x221   :  { %965 = vmatprep.subr.mxu1 %v1012_v2 }
 0x222   :  { %966 = vmatpush3.msra.mxu1 %v559_v30 }
 0x223   :  { %967 = vmatprep.subr.mxu1 %v1012_v2 }
 0x224   :  { %968 = vmatpush3.msra.mxu1 %v558_v31 }
 0x225   :  { %969 = vmatprep.subr.mxu1 %v1012_v2 }
 0x226   :  { %970 = vmatpush3.msra.mxu1 %v557_v32 }
 0x227   :  { %972 = vmatmul.mubr.msk.f32.vlgmr.msra.gmra.mxu1 %vm592_vm5, %v571_v33 }
 0x228   :  { %974 = vmatprep.mubr.msk.f32.mxu1 %vm1013_vm1, %v1012_v2 }
 0x22b   :  { %975 = vmatmul.mubr.msk.f32.gmra.mxu1 %vm592_vm5, %v572_v34 }
 0x22c   :  { %977 = vmatprep.mubr.msk.f32.mxu1 %vm1013_vm1, %v1012_v2 }
 0x22f   :  { %978 = vmatmul.mubr.msk.f32.gmra.mxu1 %vm592_vm5, %v573_v35 }
 0x2e7   :  { %v672_v38 = vpop.f32.mrf.mxu1 }
 0x2e8   :  { %v673_v41 = vadd.f32 %v672_v38, %v580_v36 }
 0x2e9   :  { %v973_v39 = vpop.f32.mrf.mxu1 }
 0x2ea   :  { %v686_v47 = vmax.f32 %v673_v41, 0.0 }
 0x2eb   :  { %v677_v42 = vpop.f32.mrf.mxu1 }
 0x2ec   :  { %v678_v43 = vadd.f32 %v677_v42, %v585_v37  ;;  %v707_v54 = vmul.f32 %v695_v44, %v686_v47 }
 0x2ed   :  { %v976_v45 = vpop.f32.mrf.mxu1 }
 0x2ee   :  { %v687_v46 = vmax.f32 %v678_v43, 0.0 }
 0x2ef   :  { %v682_v48 = vpop.f32.mrf.mxu1 }
 0x2f0   :  { %v683_v2 = vadd.f32 %v682_v48, %v590_v40  ;;  %v708_v50 = vmul.f32 %v700_v49, %v687_v46 }
 0x2f1   :  { %v979_v51 = vpop.f32.mrf.mxu1 }
 0x2f2   :  { %v688_v52 = vmax.f32 %v683_v2, 0.0  ;;  %v710_v56 = vadd.f32 %v708_v50, %v707_v54 }
 0x2f4   :  { %v709_v55 = vmul.f32 %v705_v53, %v688_v52 }
 0x2f6   :  { %v711_v57 = vsel %vm418_vm3, %v709_v55, 0.0 }
 0x2f7   :  { %v712_v59 = vadd.f32 %v711_v57, %v710_v56 }
 0x2f9   :  { %v713_v60 = vrot.slane %v712_v59, 4 }
 0x2fb   :  { %v714_v62 = vadd.f32 %v713_v60, %v712_v59 }
 0x2fd   :  { %v715_v63 = vrot.slane %v714_v62, 2 }
 0x2ff   :  { %v716_v1 = vadd.f32 %v715_v63, %v714_v62 }
 0x301   :  { %v717_v4 = vrot.slane %v716_v1, 1 }
 0x303   :  { %v718_v6 = vadd.f32 %v717_v4, %v716_v1 }
 0x305   :  { %v729_v7 = vadd.f32 %v728_v5, %v718_v6 }
 0x307   :  { %v793_v8 = vmul.f32 -1.442695, %v729_v7 }
 0x309   :  { %986 = vpow2.f32 %v793_v8 }
 0x316   :  { %v987_v9 = vpop.eup %986 }
 0x317   :  { %v733_v10 = vadd.f32 1.0, %v987_v9 }
 0x319   :  { %988 = vrcp.f32 %v733_v10 }
 0x326   :  { %v989_v11 = vpop.eup %988 }
 0x327   :  { %736 = vst [vmem:[#allocation3] sm:$0x1] %v989_v11 }
 0x328   :  { %1001 = shalt.err (!%p998_p4)
}
 0x329   :  { %746 = dma.vmem_to_hbm [thread:$0]  %s744_s2, 16, %s1378_s9, [#allocation4]  }
 0x32a   :  { %1010 = dma.done.wait [#allocation4], 16  }
 0x32b   :  { %1011 = vsyncadd [#allocation4], 4294967280 }
 0x32c   :  { %750 = vsyncpa [#allocation4], 1 }

</bundles_post_ra>
